<compile_context>
chip_gen: v6e
topology: v6e:2x2x1
jax: 0.10.0
libtpu: 0.0.40
codegen_flags: <defaults>
</compile_context>

<pallas_src>
import functools

import jax
import jax.numpy as jnp
from jax.experimental import pallas as pl
from jax.experimental.pallas import tpu as pltpu


def _fno_kernel(x_ref, w1t_ref, b1_ref, w2t_ref, b2_ref, o_ref):
    """Fused Dropout2d + (1x1 conv -> GELU -> 1x1 conv) on one (batch, spatial-tile) block.

    x_ref   : (C, TILE)        spatial tile of one sample, spatial on lanes
    w1t_ref : (HIDDEN, C)      first projection, pre-transposed, dropout folded in, bf16
    b1_ref  : (HIDDEN, 1)      f32
    w2t_ref : (COUT, HIDDEN)   second projection, pre-transposed, bf16
    b2_ref  : (COUT, 1)        f32
    o_ref   : (COUT, TILE)     lane-dense output
    """
    x = x_ref[...].astype(jnp.bfloat16)                               # (C, TILE)
    h = jnp.dot(w1t_ref[...], x, preferred_element_type=jnp.float32)  # (HIDDEN, TILE) f32
    # TODO(synk): PyTorch nn.GELU default is exact erf; tanh approximation used here.
    h = jax.nn.gelu(h + b1_ref[...])                                  # f32 elementwise
    y = jnp.dot(w2t_ref[...], h.astype(jnp.bfloat16),
                preferred_element_type=jnp.float32) + b2_ref[...]     # (COUT, TILE) f32
    o_ref[...] = y.astype(o_ref.dtype)


def _choose_tile(hw, max_tile):
    """Largest multiple-of-128 tile <= max_tile that divides HW padded up to 128."""
    hw128 = pl.cdiv(hw, 128) * 128
    k = hw128 // 128
    best = 1
    for d in range(1, k + 1):
        if k % d == 0 and d * 128 <= max_tile:
            best = d
    return best * 128, hw128


@functools.partial(jax.jit, static_argnames=("max_tile",))
def extended_fno_forward(x_nchw, mask_bc, w1, b1, w2, b2, *, max_tile=2048):
    """x_nchw: (B, C, H, W); mask_bc: (B, C) Dropout2d scales (0 or 1/(1-p))."""
    B, C, H, W = x_nchw.shape
    HW = H * W
    hidden = w1.shape[1]
    cout = w2.shape[1]

    tile, hw_pad = _choose_tile(HW, max_tile)

    # NCHW -> (B, C, HW): collapse of contiguous trailing dims, no transpose / no copy.
    x = x_nchw.reshape(B, C, HW)
    if hw_pad != HW:
        x = jnp.pad(x, ((0, 0), (0, 0), (0, hw_pad - HW)))

    # Fold Dropout2d into the first projection:  (x * m_b) @ w1 == x @ (diag(m_b) @ w1).
    # Pre-transpose both weights so the kernel matmuls put spatial on the lane axis.
    w1t_b = (jnp.swapaxes(w1, 0, 1)[None, :, :]
             * mask_bc[:, None, :]).astype(jnp.bfloat16)         # (B, HIDDEN, C)
    w2t = jnp.swapaxes(w2, 0, 1).astype(jnp.bfloat16)            # (COUT, HIDDEN)
    b1c = b1.reshape(hidden, 1).astype(jnp.float32)
    b2c = b2.reshape(cout, 1).astype(jnp.float32)

    grid = (B, hw_pad // tile)

    cost = pl.CostEstimate(
        flops=2 * B * hw_pad * (C * hidden + hidden * cout),
        transcendentals=B * hw_pad * hidden,
        bytes_accessed=(B * C * hw_pad * x.dtype.itemsize
                        + B * cout * hw_pad * 4
                        + B * hidden * C * 2 + cout * hidden * 2
                        + hidden * 4 + cout * 4),
    )

    out = pl.pallas_call(
        _fno_kernel,
        out_shape=jax.ShapeDtypeStruct((B, cout, hw_pad), jnp.float32),
        grid_spec=pltpu.PrefetchScalarGridSpec(
            num_scalar_prefetch=0,
            grid=grid,
            in_specs=[
                pl.BlockSpec((pl.Squeezed(), C, tile), lambda b, t: (b, 0, t)),       # x
                pl.BlockSpec((pl.Squeezed(), hidden, C), lambda b, t: (b, 0, 0)),     # w1^T (per-batch)
                pl.BlockSpec((hidden, 1), lambda b, t: (0, 0)),                       # b1
                pl.BlockSpec((cout, hidden), lambda b, t: (0, 0)),                    # w2^T
                pl.BlockSpec((cout, 1), lambda b, t: (0, 0)),                         # b2
            ],
            out_specs=pl.BlockSpec((pl.Squeezed(), cout, tile), lambda b, t: (b, 0, t)),
        ),
        compiler_params=pltpu.CompilerParams(
            dimension_semantics=("parallel", "parallel")),
        cost_estimate=cost,
    )(x, w1t_b, b1c, w2t, b2c)

    if hw_pad != HW:
        out = out[:, :, :HW]
    return out.reshape(B, cout, H, W)


def _reference(x_nchw, mask_bc, w1, b1, w2, b2):
    """Pure-JAX f32 reference of the same forward (Dropout2d mask applied explicitly)."""
    x = x_nchw * mask_bc[:, :, None, None]
    h = jnp.einsum("bchw,cd->bdhw", x, w1) + b1[None, :, None, None]
    h = jax.nn.gelu(h)
    y = jnp.einsum("bdhw,de->behw", h, w2) + b2[None, :, None, None]
    return y


if __name__ == "__main__":
    # Small shapes consistent with the module's NCHW forward.
    B, C, H, W = 2, 4, 16, 16
    HIDDEN, COUT = 32, 4
    DROPOUT_P = 0.25

    key = jax.random.PRNGKey(0)
    kx, kmask, kw1, kb1, kw2, kb2 = jax.random.split(key, 6)

    x = jax.random.normal(kx, (B, C, H, W), dtype=jnp.float32)

    # Deterministic Dropout2d mask: per-(sample, channel) keep, scaled by 1/(1-p).
    keep = jax.random.bernoulli(kmask, 1.0 - DROPOUT_P, (B, C))
    mask_bc = keep.astype(jnp.float32) / (1.0 - DROPOUT_P)

    # Deterministic "new_fno" output-head parameters.
    w1 = jax.random.normal(kw1, (C, HIDDEN), dtype=jnp.float32) * 0.1
    b1 = jax.random.normal(kb1, (HIDDEN,), dtype=jnp.float32) * 0.01
    w2 = jax.random.normal(kw2, (HIDDEN, COUT), dtype=jnp.float32) * 0.1
    b2 = jax.random.normal(kb2, (COUT,), dtype=jnp.float32) * 0.01

    out = extended_fno_forward(x, mask_bc, w1, b1, w2, b2)
    out = jax.block_until_ready(out)

    ref = _reference(x, mask_bc, w1, b1, w2, b2)
    assert out.shape == (B, COUT, H, W), out.shape
    # bf16 MXU path vs f32 reference -> loose-ish tolerance.
    max_err = float(jnp.max(jnp.abs(out - ref)))
    assert jnp.allclose(out, ref, atol=3e-2, rtol=3e-2), max_err

    print("KERNEL_OK")
</pallas_src>

<mosaic_0001>
module attributes {stable_mosaic.version = 11 : i64} {
  func.func @_fno_kernel(%arg0: i32, %arg1: i32, %arg2: memref<1x4x256xf32, #tpu.memory_space<vmem>>, %arg3: memref<1x32x4xbf16, #tpu.memory_space<vmem>>, %arg4: memref<32x1xf32, #tpu.memory_space<vmem>>, %arg5: memref<4x32xbf16, #tpu.memory_space<vmem>>, %arg6: memref<4x1xf32, #tpu.memory_space<vmem>>, %arg7: memref<1x4x256xf32, #tpu.memory_space<vmem>>) attributes {dimension_semantics = [#tpu.dimension_semantics<parallel>, #tpu.dimension_semantics<parallel>], iteration_bounds = array<i64: 2, 1>, scalar_prefetch = 0 : i64, scratch_operands = 0 : i64, tpu.core_type = #tpu.core_type<tc>, window_params = [{transform_indices = @transform_0, window_bounds = array<i64: 1, 4, 256>}, {transform_indices = @transform_1, window_bounds = array<i64: 1, 32, 4>}, {pipeline_mode = #tpu.pipeline_mode<synchronous>, transform_indices = @transform_2, window_bounds = array<i64: 32, 1>}, {pipeline_mode = #tpu.pipeline_mode<synchronous>, transform_indices = @transform_3, window_bounds = array<i64: 4, 32>}, {pipeline_mode = #tpu.pipeline_mode<synchronous>, transform_indices = @transform_4, window_bounds = array<i64: 4, 1>}, {transform_indices = @transform_5, window_bounds = array<i64: 1, 4, 256>}]} {
    %c0 = arith.constant 0 : index
    %c0_0 = arith.constant 0 : index
    %c0_1 = arith.constant 0 : index
    %0 = vector.load %arg2[%c0, %c0_0, %c0_1] : memref<1x4x256xf32, #tpu.memory_space<vmem>>, vector<1x4x256xf32>
    %1 = vector.shape_cast %0 : vector<1x4x256xf32> to vector<4x256xf32>
    %2 = arith.truncf %1 : vector<4x256xf32> to vector<4x256xbf16>
    %c0_2 = arith.constant 0 : index
    %c0_3 = arith.constant 0 : index
    %c0_4 = arith.constant 0 : index
    %3 = vector.load %arg3[%c0_2, %c0_3, %c0_4] : memref<1x32x4xbf16, #tpu.memory_space<vmem>>, vector<1x32x4xbf16>
    %4 = vector.shape_cast %3 : vector<1x32x4xbf16> to vector<32x4xbf16>
    %cst = arith.constant dense<0.000000e+00> : vector<32x256xf32>
    %5 = tpu.matmul %4, %2, %cst {dimension_numbers = #tpu.dot_dimension_numbers<[1], [0], [0], [1], [0, 0, 1, 1], [], []>} : vector<32x4xbf16>, vector<4x256xbf16>, vector<32x256xf32> -> vector<32x256xf32>
    %c0_5 = arith.constant 0 : index
    %c0_6 = arith.constant 0 : index
    %6 = vector.load %arg4[%c0_5, %c0_6] : memref<32x1xf32, #tpu.memory_space<vmem>>, vector<32x1xf32>
    %7 = vector.broadcast %6 : vector<32x1xf32> to vector<32x256xf32>
    %8 = arith.addf %5, %7 : vector<32x256xf32>
    %9 = arith.mulf %8, %8 : vector<32x256xf32>
    %10 = arith.mulf %8, %9 : vector<32x256xf32>
    %cst_7 = arith.constant 4.471500e-02 : f32
    %11 = vector.broadcast %cst_7 : f32 to vector<32x256xf32>
    %12 = arith.mulf %11, %10 : vector<32x256xf32>
    %13 = arith.addf %8, %12 : vector<32x256xf32>
    %cst_8 = arith.constant 0.797884583 : f32
    %14 = vector.broadcast %cst_8 : f32 to vector<32x256xf32>
    %15 = arith.mulf %14, %13 : vector<32x256xf32>
    %16 = math.tanh %15 : vector<32x256xf32>
    %cst_9 = arith.constant 1.000000e+00 : f32
    %17 = vector.broadcast %cst_9 : f32 to vector<32x256xf32>
    %18 = arith.addf %17, %16 : vector<32x256xf32>
    %cst_10 = arith.constant 5.000000e-01 : f32
    %19 = vector.broadcast %cst_10 : f32 to vector<32x256xf32>
    %20 = arith.mulf %19, %18 : vector<32x256xf32>
    %21 = arith.mulf %8, %20 : vector<32x256xf32>
    %c0_11 = arith.constant 0 : index
    %c0_12 = arith.constant 0 : index
    %22 = vector.load %arg5[%c0_11, %c0_12] : memref<4x32xbf16, #tpu.memory_space<vmem>>, vector<4x32xbf16>
    %23 = arith.truncf %21 : vector<32x256xf32> to vector<32x256xbf16>
    %cst_13 = arith.constant dense<0.000000e+00> : vector<4x256xf32>
    %24 = tpu.matmul %22, %23, %cst_13 {dimension_numbers = #tpu.dot_dimension_numbers<[1], [0], [0], [1], [0, 0, 1, 1], [], []>} : vector<4x32xbf16>, vector<32x256xbf16>, vector<4x256xf32> -> vector<4x256xf32>
    %c0_14 = arith.constant 0 : index
    %c0_15 = arith.constant 0 : index
    %25 = vector.load %arg6[%c0_14, %c0_15] : memref<4x1xf32, #tpu.memory_space<vmem>>, vector<4x1xf32>
    %26 = vector.broadcast %25 : vector<4x1xf32> to vector<4x256xf32>
    %27 = arith.addf %24, %26 : vector<4x256xf32>
    %c0_16 = arith.constant 0 : index
    %c0_17 = arith.constant 0 : index
    %c0_18 = arith.constant 0 : index
    %28 = vector.load %arg7[%c0_16, %c0_17, %c0_18] : memref<1x4x256xf32, #tpu.memory_space<vmem>>, vector<1x4x256xf32>
    %29 = vector.shape_cast %28 : vector<1x4x256xf32> to vector<4x256xf32>
    %30 = vector.shape_cast %27 : vector<4x256xf32> to vector<1x4x256xf32>
    tpu.vector_store %arg7[%c0_16, %c0_17, %c0_18], %30 {strides = array<i32>} : memref<1x4x256xf32, #tpu.memory_space<vmem>>, vector<1x4x256xf32>,
    return
  }
  func.func @transform_0(%arg0: i32, %arg1: i32) -> (i32, i32, i32) {
    %c0_i32 = arith.constant 0 : i32
    %c0_i32_0 = arith.constant 0 : i32
    return %arg0, %c0_i32, %arg1 : i32, i32, i32
  }
  func.func @transform_1(%arg0: i32, %arg1: i32) -> (i32, i32, i32) {
    %c0_i32 = arith.constant 0 : i32
    %c0_i32_0 = arith.constant 0 : i32
    %c0_i32_1 = arith.constant 0 : i32
    return %arg0, %c0_i32, %c0_i32_0 : i32, i32, i32
  }
  func.func @transform_2(%arg0: i32, %arg1: i32) -> (i32, i32) {
    %c0_i32 = arith.constant 0 : i32
    %c0_i32_0 = arith.constant 0 : i32
    %c0_i32_1 = arith.constant 0 : i32
    return %c0_i32, %c0_i32_0 : i32, i32
  }
  func.func @transform_3(%arg0: i32, %arg1: i32) -> (i32, i32) {
    %c0_i32 = arith.constant 0 : i32
    %c0_i32_0 = arith.constant 0 : i32
    %c0_i32_1 = arith.constant 0 : i32
    return %c0_i32, %c0_i32_0 : i32, i32
  }
  func.func @transform_4(%arg0: i32, %arg1: i32) -> (i32, i32) {
    %c0_i32 = arith.constant 0 : i32
    %c0_i32_0 = arith.constant 0 : i32
    %c0_i32_1 = arith.constant 0 : i32
    return %c0_i32, %c0_i32_0 : i32, i32
  }
  func.func @transform_5(%arg0: i32, %arg1: i32) -> (i32, i32, i32) {
    %c0_i32 = arith.constant 0 : i32
    %c0_i32_0 = arith.constant 0 : i32
    return %arg0, %c0_i32, %arg1 : i32, i32, i32
  }
}

</mosaic_0001>

<bundles_post_ra>
// kernel: extended_fno_forward.1
= control target key start
LH: loop header
LB: loop body
LE: loop exit
PB: predicated region body
PF: predicated region fallthrough
CT: control target
= control target key end

     0   :  { %s751_s18 = smov 0   ;;  %s753_s19 = smov 0   ;;  %s855_s0 = inlined_call_operand.vmem [shape: f32[2,4,256], index: 0, kind: input, shape index: {}]   ;;  %s856_s1 = inlined_call_operand.vmem [shape: bf16[2,32,4], index: 1, kind: input, shape index: {}]   ;;  %s857_s2 = inlined_call_operand.vmem [shape: f32[32,1], index: 2, kind: input, shape index: {}]   ;;  %s858_s3 = inlined_call_operand.vmem [shape: bf16[4,32], index: 3, kind: input, shape index: {}]   ;;  %s859_s4 = inlined_call_operand.vmem [shape: f32[4,1], index: 4, kind: input, shape index: {}]   ;;  %s860_s5 = inlined_call_operand.vmem [shape: f32[2,4,256], index: 5, kind: output, shape index: {}]  }
   0x1   :  { %s755_s20 = smov 0  }
   0x2 LB: > { %s27_s21 = sadd.s32 1, %s714_s19  ;;  %p632_p0 = scmp.ge.s32.totalorder %s718_s20, 1  ;;  %s718_s20 = sphi %s755_s20, %s15_s20   ;;  %s714_s19 = sphi %s753_s19, %s862_s19   ;;  %s710_s18 = sphi %s751_s18, %s861_s18  }
   0x3   : > { %p29_p1 = scmp.ge.s32.totalorder %s27_s21, 2  ;;  %p218_p2 = scmp.lt.s32.totalorder %s718_s20, 3 }
   0x5   : > { %s864_s21 = smov (%p29_p1, %s27_s21), 0  ;;  %p219_p3 = pnand %p632_p0, %p218_p2 }
   0x6   : > { %p260_p4 = scmp.lt.s32.totalorder (!%p219_p3), %s710_s18, 1 }
   0x7   : > { %222 = sbr.rel (%p219_p3) target bundleno = 473 (0x1d9), region = 40 }
   0xc   : > { %v295_v0 = vld [vmem:[%s857_s2] sm:$0xff]  ;;  %v297_v1 = vld [vmem:[%s857_s2 + $0x10] sm:$0xff]  ;;  %v720_v2 = vmov 0   ;;  %s866_s18 = smov (!%p260_p4, %s710_s18), 1  ;;  %v296_v3 = vld [vmem:[%s857_s2 + $0x8] sm:$0xff]  ;;  %vm336_vm0 = vcmask 1041408  }
   0xd   : > { %375 = vmatprep.mubr.bf16.mxu0 %v720_v2  ;;  %676 = vset.pattern.permute.xlu1 %v720_v2  ;;  %s647_s28 = sshll.u32 %s866_s18, 3  ;;  %s648_s29 = sshll.u32 %s866_s18, 4  ;;  %v298_v4 = vld [vmem:[%s857_s2 + $0x18] sm:$0xff]  ;;  %v473_v8 = vld [vmem:[%s859_s4] sm:$0xf]  ;;  %vm329_vm1 = vcmask 31744  }
   0xe   : > { %301 = vperm.xlu1 %676, %v295_v0   ;;  %675 = vset.pattern.permute.xlu0 %v720_v2  ;;  %s267_s9 = scalar_lea.vmem %s855_s0, %s647_s28  ;;  %s273_s12 = scalar_lea.vmem %s856_s1, %s648_s29  ;;  %vm479_vm2 = vcmask 261120  }
   0xf   : > { %311 = vperm.xlu0 %675, %v297_v1   ;;  %515 = vmatprep.mubr.bf16.mxu1 %v720_v2  ;;  %v285_v5 = vld [vmem:[%s267_s9] sm:$0xff]  ;;  %v679_v12 = vld [vmem:[%s273_s12 + $0x8] sm:$0xff]   ;;  %s282_s23 = scalar_lea.vmem %s860_s5, %s647_s28 }
  0x10   : > { %v287_v6 = vcombine.high %v285_v5, %v285_v5  ;;  %v289_v7 = vpack.c.bf16 %v285_v5, %v285_v5  ;;  %v678_v11 = vld [vmem:[%s273_s12] sm:$0xff]  }
  0x12   : > { %306 = vperm.xlu1 %676, %v296_v3   ;;  %v290_v9 = vpack.c.bf16 %v287_v6, %v287_v6  ;;  %v338_v10 = vsel %vm336_vm0, %v289_v7, 0 }
  0x13   : > { %316 = vperm.xlu0 %675, %v298_v4  }
  0x14   : > { %641 = vmatprep.subr.msk.bf16.mxu0 %vm336_vm0, %v290_v9 }
  0x15   : > { %358 = vmatpush1.bf16.msra.mxu0 %v338_v10 }
  0x17   : > { %476 = vperm.xlu0 %675, %v473_v8  }
  0x18   : > { %642 = vmatmul.mubr.msk.bf16.vlgmr.msra.gmra.mxu0 %vm329_vm1, %v678_v11 }
  0x19   : > { %385 = vmatprep.mubr.bf16.mxu0 %v720_v2 }
  0x20   : > { %643 = vmatmul.mubr.msk.bf16.gmra.mxu0 %vm329_vm1, %v679_v12 }
  0x89   : > { %v302_v13 = vpop.permute.xlu1 %301 }
  0x8a   : > { %v312_v24 = vpop.permute.xlu0 %311 }
  0x8d   : > { %v307_v17 = vpop.permute.xlu1 %306 }
  0x8e   : > { %v317_v42 = vpop.permute.xlu0 %316 }
  0xd8   : > { %v377_v14 = vpop.f32.mrf.mxu0 }
  0xd9   : > { %v796_v15 = vadd.f32 %v377_v14, %v302_v13 }
  0xda   : > { %v379_v16 = vpop.f32.mrf.mxu0 }
  0xdb   : > { %v798_v18 = vadd.f32 %v379_v16, %v302_v13  ;;  %v396_v20 = vmul.f32 %v796_v15, %v796_v15 }
  0xdc   : > { %v381_v19 = vpop.f32.mrf.mxu0 }
  0xdd   : > { %v397_v21 = vmul.f32 %v798_v18, %v798_v18  ;;  %v804_v22 = vadd.f32 %v381_v19, %v307_v17  ;;  %v404_v29 = vmul.f32 %v396_v20, %v796_v15 }
  0xde   : > { %v383_v23 = vpop.f32.mrf.mxu0 }
  0xdf   : > { %v405_v25 = vmul.f32 %v397_v21, %v798_v18  ;;  %v398_v26 = vmul.f32 %v804_v22, %v804_v22  ;;  %v809_v27 = vadd.f32 %v383_v23, %v307_v17  ;;  %v412_v41 = vmul.f32 0.044715, %v404_v29 }
  0xe0   : > { %v387_v28 = vpop.f32.mrf.mxu0 }
  0xe1   : > { %v413_v30 = vmul.f32 0.044715, %v405_v25  ;;  %v406_v31 = vmul.f32 %v398_v26, %v804_v22  ;;  %v399_v32 = vmul.f32 %v809_v27, %v809_v27  ;;  %v815_v33 = vadd.f32 %v387_v28, %v312_v24 }
  0xe2   : > { %v389_v34 = vpop.f32.mrf.mxu0  ;;  %v420_v55 = vadd.f32 %v412_v41, %v796_v15 }
  0xe3   : > { %v414_v35 = vmul.f32 0.044715, %v406_v31  ;;  %v407_v36 = vmul.f32 %v399_v32, %v809_v27  ;;  %v421_v37 = vadd.f32 %v413_v30, %v798_v18  ;;  %v400_v38 = vmul.f32 %v815_v33, %v815_v33 }
  0xe4   : > { %v821_v39 = vadd.f32 %v389_v34, %v312_v24  ;;  %v391_v40 = vpop.f32.mrf.mxu0  ;;  %v428_v2 = vmul.f32 0.7978846, %v420_v55 }
  0xe5   : > { %v415_v43 = vmul.f32 0.044715, %v407_v36  ;;  %v408_v44 = vmul.f32 %v400_v38, %v815_v33  ;;  %v392_v46 = vadd.f32 %v391_v40, %v317_v42  ;;  %v422_v48 = vadd.f32 %v414_v35, %v804_v22 }
  0xe6   : > { %v401_v45 = vmul.f32 %v821_v39, %v821_v39  ;;  %v393_v47 = vpop.f32.mrf.mxu0  ;;  %v429_v51 = vmul.f32 0.7978846, %v421_v37 }
  0xe7   : > { %v423_v49 = vadd.f32 %v415_v43, %v809_v27  ;;  %v394_v50 = vadd.f32 %v393_v47, %v317_v42  ;;  %v416_v52 = vmul.f32 0.044715, %v408_v44  ;;  %v402_v54 = vmul.f32 %v392_v46, %v392_v46 }
  0xe8   : > { %v409_v53 = vmul.f32 %v401_v45, %v821_v39  ;;  %v430_v61 = vmul.f32 0.7978846, %v422_v48  ;;  %680 = vtanh.f32 %v429_v51 }
  0xe9   : > { %v431_v56 = vmul.f32 0.7978846, %v423_v49  ;;  %v403_v57 = vmul.f32 %v394_v50, %v394_v50  ;;  %v424_v58 = vadd.f32 %v416_v52, %v815_v33  ;;  %v410_v60 = vmul.f32 %v402_v54, %v392_v46 }
  0xea   : > { %v417_v59 = vmul.f32 0.044715, %v409_v53 }
  0xeb   : > { %v411_v62 = vmul.f32 %v403_v57, %v394_v50  ;;  %v432_v63 = vmul.f32 0.7978846, %v424_v58  ;;  %v418_v1 = vmul.f32 0.044715, %v410_v60  ;;  %682 = vtanh.f32 %v431_v56 }
  0xec   : > { %v425_v0 = vadd.f32 %v417_v59, %v821_v39 }
  0xed   : > { %v419_v3 = vmul.f32 0.044715, %v411_v62  ;;  %v426_v4 = vadd.f32 %v418_v1, %v392_v46  ;;  %684 = vtanh.f32 %v432_v63 }
  0xee   : > { %v433_v5 = vmul.f32 0.7978846, %v425_v0  ;;  %686 = vtanh.f32 %v430_v61 }
  0xef   : > { %v427_v6 = vadd.f32 %v419_v3, %v394_v50  ;;  %v434_v7 = vmul.f32 0.7978846, %v426_v4 }
  0xf0   : > { %688 = vtanh.f32 %v433_v5 }
  0xf1   : > { %690 = vtanh.f32 %v428_v2  ;;  %v435_v8 = vmul.f32 0.7978846, %v427_v6 }
  0xf2   : > { %692 = vtanh.f32 %v434_v7 }
  0xf3   : > { %694 = vtanh.f32 %v435_v8 }
  0xf5   : > { %v681_v9 = vpop.eup %680 }
  0xf6   : > { %v445_v21 = vadd.f32 1.0, %v681_v9 }
  0xf8   : > { %v683_v10 = vpop.eup %682  ;;  %v453_v35 = vmul.f32 0.5, %v445_v21 }
  0xf9   : > { %v447_v14 = vadd.f32 1.0, %v683_v10 }
  0xfa   : > { %v685_v11 = vpop.eup %684  ;;  %v461_v45 = vmul.f32 %v453_v35, %v798_v18  ;;  %v477_v18 = vpop.permute.xlu0 %476 }
  0xfb   : > { %v687_v12 = vpop.eup %686  ;;  %v448_v19 = vadd.f32 1.0, %v685_v11  ;;  %v455_v29 = vmul.f32 0.5, %v447_v14 }
  0xfc   : > { %v446_v25 = vadd.f32 1.0, %v687_v12 }
  0xfd   : > { %v689_v13 = vpop.eup %688  ;;  %v456_v30 = vmul.f32 0.5, %v448_v19  ;;  %v463_v41 = vmul.f32 %v455_v29, %v809_v27  ;;  %v468_v27 = vld [vmem:[%s858_s3] sm:$0x3] }
  0xfe   : > { %v691_v16 = vpop.eup %690  ;;  %v449_v17 = vadd.f32 1.0, %v689_v13  ;;  %v454_v37 = vmul.f32 0.5, %v446_v25 }
  0xff   : > { %v693_v20 = vpop.eup %692  ;;  %v444_v32 = vadd.f32 1.0, %v691_v16  ;;  %v464_v42 = vmul.f32 %v456_v30, %v815_v33  ;;  %v470_v49 = vpack.c.bf16 %v463_v41, %v461_v45 }
 0x100   : > { %v695_v23 = vpop.eup %694  ;;  %v450_v24 = vadd.f32 1.0, %v693_v20  ;;  %v457_v28 = vmul.f32 0.5, %v449_v17  ;;  %v462_v48 = vmul.f32 %v454_v37, %v804_v22 }
 0x101   : > { %v451_v26 = vadd.f32 1.0, %v695_v23  ;;  %v452_v43 = vmul.f32 0.5, %v444_v32 }
 0x102   : > { %v458_v31 = vmul.f32 0.5, %v450_v24  ;;  %v465_v38 = vmul.f32 %v457_v28, %v821_v39 }
 0x103   : > { %v459_v34 = vmul.f32 0.5, %v451_v26 }
 0x104   : > { %v466_v36 = vmul.f32 %v458_v31, %v392_v46  ;;  %v460_v46 = vmul.f32 %v452_v43, %v796_v15 }
 0x105   : > { %v467_v40 = vmul.f32 %v459_v34, %v394_v50 }
 0x106   : > { %v471_v47 = vpack.c.bf16 %v466_v36, %v464_v42  ;;  %v469_v39 = vpack.c.bf16 %v462_v48, %v460_v46 }
 0x107   : > { %v472_v44 = vpack.c.bf16 %v467_v40, %v465_v38 }
 0x109   : > { %495 = vmatprep.subr.bf16.mxu1 %v472_v44 }
 0x10a   : > { %496 = vmatpush1.bf16.msra.mxu1 %v471_v47 }
 0x10b   : > { %497 = vmatprep.subr.bf16.mxu1 %v470_v49 }
 0x10e   : > { %498 = vmatpush1.bf16.msra.mxu1 %v469_v39 }
 0x111   : > { %644 = vmatmul.mubr.msk.bf16.vlgmr.msra.gmra.mxu1 %vm479_vm2, %v468_v27 }
 0x1d1   : > { %v517_v33 = vpop.f32.mrf.mxu1 }
 0x1d2   : > { %v518_v51 = vadd.f32 %v517_v33, %v477_v18 }
 0x1d3   : > { %v519_v50 = vpop.f32.mrf.mxu1 }
 0x1d4   : > { %v520_v22 = vadd.f32 %v519_v50, %v477_v18 }
 0x1d5   : > { %v521_v15 = vpop.f32.mrf.mxu1 }
 0x1d6   : > { %v526_v52 = vcombine.low %v518_v51, %v520_v22 }
 0x1d7   : > { %v522_v53 = vpop.f32.mrf.mxu1 }
 0x1d8   : > { %528 = vst [vmem:[%s282_s23] sm:$0xff] %v526_v52 }
 0x1d9 PF: > { %s15_s20 = sadd.s32 1, %s718_s20   ;;  %s861_s18 = smov %s714_s19 }
 0x1da   : > { %p12_p5 = scmp.ge.s32.totalorder %s15_s20, 4   ;;  %s862_s19 = smov %s864_s21 }
 0x1dc   :  { %14 = sbr.rel (!%p12_p5) target bundleno = 2 (0x2), region = 73 }

</bundles_post_ra>
